<compile_context>
chip_gen: v7x
topology: tpu7x:2x2x1
jax: 0.10.0
libtpu: 0.0.40
codegen_flags: <defaults>
</compile_context>

<pallas_src>
import math

import jax
import jax.numpy as jnp
from jax import lax
from jax.experimental import pallas as pl
from jax.experimental.pallas import tpu as pltpu

_K_AUG = 8          # fc1 contraction dim padded 4 -> 8 (bias row + zero rows)
_MIN_TILE = 256     # smallest batch tile for the multi-block path
_LANE = 128


def _policy_kernel(xT_ref, w1a_ref, w2_ref, b2_ref, outT_ref):
    # xT_ref : [K_AUG, tile]        rows 0..3 = obs^T, row 4 = 1, rows 5..7 = 0
    # w1a_ref: [hidden, K_AUG]      cols 0..3 = W1, col 4 = b1, cols 5..7 = 0
    # w2_ref : [n_actions, hidden]  PyTorch-native fc2 weight
    # b2_ref : [n_actions, 1]
    # outT_ref: [n_actions, tile]   lane-dense output block

    # ---- fc1 + ReLU on the MXU (bias folded into the matmul) ---------------
    h = jnp.dot(w1a_ref[...], xT_ref[...],
                preferred_element_type=jnp.float32,
                precision=lax.Precision.HIGHEST)          # [hidden, tile]
    h = jnp.maximum(h, 0.0)

    # ---- fc2 on the MXU (weights used in native [n_actions, hidden] layout) -
    logits = jnp.dot(w2_ref[...], h,
                     preferred_element_type=jnp.float32,
                     precision=lax.Precision.HIGHEST)     # [n_actions, tile]
    logits = logits + b2_ref[...]

    # ---- numerically-stable softmax over actions (sublane axis) ------------
    m = jnp.max(logits, axis=0, keepdims=True)            # [1, tile]
    e = jnp.exp(logits - m)                               # EUP
    denom = jnp.sum(e, axis=0, keepdims=True)             # [1, tile]
    inv = pl.reciprocal(denom, approx=True)               # EUP slot
    inv = inv * (2.0 - denom * inv)                       # 1 Newton step
    outT_ref[...] = e * inv

    # TODO(synk): fuse categorical action sampling / log-prob output in-kernel
    # (pltpu.prng_seed + pltpu.prng_random_bits + Gumbel trick) to amortize the
    # per-call overhead in the B=2 rollout loop, which is launch-latency bound.


def _choose_tile(batch, row_tile):
    """Pick a lane-aligned batch tile; guarantee >=2 grid steps for big batches."""
    if batch <= _MIN_TILE:
        # Tiny rollout batches: one small lane-aligned block.
        return max(_LANE, ((batch + _LANE - 1) // _LANE) * _LANE)
    tile = max(_MIN_TILE, (row_tile // _LANE) * _LANE)
    # Ensure at least two grid steps so both v7x TensorCores get work.
    while tile > _MIN_TILE and pl.cdiv(batch, tile) < 2:
        tile //= 2
    return tile


def policy_forward(state, w1, b1, w2, b2, *, row_tile=2048):
    """state: [B, obs_dim] f32 -> action_probs: [B, n_actions] f32."""
    batch, obs_dim = state.shape
    hidden, _ = w1.shape
    n_actions = w2.shape[0]

    tile = _choose_tile(batch, row_tile)
    padded = pl.cdiv(batch, tile) * tile
    grid = (padded // tile,)

    # Batch-on-lanes input: [K_AUG, padded] with a constant-1 row for the bias.
    xT = jnp.concatenate(
        [state.T,
         jnp.ones((1, batch), jnp.float32),
         jnp.zeros((_K_AUG - obs_dim - 1, batch), jnp.float32)], axis=0)
    if padded != batch:
        xT = jnp.pad(xT, ((0, 0), (0, padded - batch)))

    # Augmented fc1 weight: [hidden, K_AUG] = [W1 | b1 | 0].
    w1_aug = jnp.concatenate(
        [w1, b1.reshape(hidden, 1),
         jnp.zeros((hidden, _K_AUG - obs_dim - 1), jnp.float32)], axis=1)
    b2_col = b2.reshape(n_actions, 1)

    probs_T = pl.pallas_call(
        _policy_kernel,
        out_shape=jax.ShapeDtypeStruct((n_actions, padded), jnp.float32),
        grid=grid,
        in_specs=[
            pl.BlockSpec((_K_AUG, tile), lambda i: (0, i)),
            pl.BlockSpec((hidden, _K_AUG), lambda i: (0, 0)),
            pl.BlockSpec((n_actions, hidden), lambda i: (0, 0)),
            pl.BlockSpec((n_actions, 1), lambda i: (0, 0)),
        ],
        out_specs=pl.BlockSpec((n_actions, tile), lambda i: (0, i)),
        compiler_params=pltpu.CompilerParams(
            dimension_semantics=("parallel",),
            vmem_limit_bytes=32 * 1024 * 1024),
    )(xT, w1_aug, w2, b2_col)

    return probs_T[:, :batch].T                            # [B, n_actions]


def init_params(key, input_dim, hidden_dim, output_dim):
    """Deterministic init matching nn.Linear's U(-1/sqrt(fan_in), ...) with
    PyTorch-native layouts: w1 [hidden, in], b1 [hidden], w2 [out, hidden], b2 [out]."""
    k1, k2, k3, k4 = jax.random.split(key, 4)
    bound1 = 1.0 / math.sqrt(input_dim)
    bound2 = 1.0 / math.sqrt(hidden_dim)
    w1 = jax.random.uniform(k1, (hidden_dim, input_dim), jnp.float32, -bound1, bound1)
    b1 = jax.random.uniform(k2, (hidden_dim,), jnp.float32, -bound1, bound1)
    w2 = jax.random.uniform(k3, (output_dim, hidden_dim), jnp.float32, -bound2, bound2)
    b2 = jax.random.uniform(k4, (output_dim,), jnp.float32, -bound2, bound2)
    return w1, b1, w2, b2


if __name__ == "__main__":
    # CartPole-v1: obs_dim=4, n_actions=2, hidden=128 (as in the module's usage).
    batch, obs_dim, hidden_dim, n_actions = 2, 4, 128, 2

    key = jax.random.PRNGKey(0)
    k_params, k_obs, k_obs_big = jax.random.split(key, 3)
    w1, b1, w2, b2 = init_params(k_params, obs_dim, hidden_dim, n_actions)
    obs = jax.random.normal(k_obs, (batch, obs_dim), jnp.float32)

    def ref_forward(x):
        h = jnp.maximum(x @ w1.T + b1, 0.0)
        return jax.nn.softmax(h @ w2.T + b2, axis=-1)

    # Tiny-batch rollout path (single lane-aligned block).
    probs = jax.block_until_ready(policy_forward(obs, w1, b1, w2, b2))
    assert probs.shape == (batch, n_actions)
    assert jnp.allclose(probs, ref_forward(obs), atol=1e-5)
    assert jnp.allclose(jnp.sum(probs, axis=-1), 1.0, atol=1e-5)

    # Multi-block tiled path with a batch that is NOT a multiple of the tile
    # (exercises the cdiv padding + >=2 "parallel" grid steps).
    obs_big = jax.random.normal(k_obs_big, (300, obs_dim), jnp.float32)
    probs_big = jax.block_until_ready(policy_forward(obs_big, w1, b1, w2, b2))
    assert probs_big.shape == (300, n_actions)
    assert jnp.allclose(probs_big, ref_forward(obs_big), atol=1e-5)
    assert jnp.allclose(jnp.sum(probs_big, axis=-1), 1.0, atol=1e-5)

    print("KERNEL_OK")
</pallas_src>

<mosaic_0001>
module attributes {stable_mosaic.version = 11 : i64} {
  func.func @_policy_kernel(%arg0: i32, %arg1: memref<8x128xf32, #tpu.memory_space<vmem>>, %arg2: memref<128x8xf32, #tpu.memory_space<vmem>>, %arg3: memref<2x128xf32, #tpu.memory_space<vmem>>, %arg4: memref<2x1xf32, #tpu.memory_space<vmem>>, %arg5: memref<2x128xf32, #tpu.memory_space<vmem>>) attributes {dimension_semantics = [#tpu.dimension_semantics<parallel>], iteration_bounds = array<i64: 1>, scalar_prefetch = 0 : i64, scratch_operands = 0 : i64, tpu.core_type = #tpu.core_type<tc>, window_params = [{transform_indices = @transform_0, window_bounds = array<i64: 8, 128>}, {pipeline_mode = #tpu.pipeline_mode<synchronous>, transform_indices = @transform_1, window_bounds = array<i64: 128, 8>}, {pipeline_mode = #tpu.pipeline_mode<synchronous>, transform_indices = @transform_2, window_bounds = array<i64: 2, 128>}, {pipeline_mode = #tpu.pipeline_mode<synchronous>, transform_indices = @transform_3, window_bounds = array<i64: 2, 1>}, {transform_indices = @transform_4, window_bounds = array<i64: 2, 128>}]} {
    %c0 = arith.constant 0 : index
    %c0_0 = arith.constant 0 : index
    %0 = vector.load %arg2[%c0, %c0_0] : memref<128x8xf32, #tpu.memory_space<vmem>>, vector<128x8xf32>
    %c0_1 = arith.constant 0 : index
    %c0_2 = arith.constant 0 : index
    %1 = vector.load %arg1[%c0_1, %c0_2] : memref<8x128xf32, #tpu.memory_space<vmem>>, vector<8x128xf32>
    %cst = arith.constant dense<0.000000e+00> : vector<128x128xf32>
    %2 = tpu.matmul %0, %1, %cst {dimension_numbers = #tpu.dot_dimension_numbers<[1], [0], [0], [1], [0, 0, 1, 1], [], []>, precision = #tpu.contract_precision<fp32>} : vector<128x8xf32>, vector<8x128xf32>, vector<128x128xf32> -> vector<128x128xf32>
    %cst_3 = arith.constant 0.000000e+00 : f32
    %3 = vector.broadcast %cst_3 : f32 to vector<128x128xf32>
    %4 = arith.maximumf %2, %3 : vector<128x128xf32>
    %c0_4 = arith.constant 0 : index
    %c0_5 = arith.constant 0 : index
    %5 = vector.load %arg3[%c0_4, %c0_5] : memref<2x128xf32, #tpu.memory_space<vmem>>, vector<2x128xf32>
    %cst_6 = arith.constant dense<0.000000e+00> : vector<2x128xf32>
    %6 = tpu.matmul %5, %4, %cst_6 {dimension_numbers = #tpu.dot_dimension_numbers<[1], [0], [0], [1], [0, 0, 1, 1], [], []>, precision = #tpu.contract_precision<fp32>} : vector<2x128xf32>, vector<128x128xf32>, vector<2x128xf32> -> vector<2x128xf32>
    %c0_7 = arith.constant 0 : index
    %c0_8 = arith.constant 0 : index
    %7 = vector.load %arg4[%c0_7, %c0_8] : memref<2x1xf32, #tpu.memory_space<vmem>>, vector<2x1xf32>
    %8 = vector.broadcast %7 : vector<2x1xf32> to vector<2x128xf32>
    %9 = arith.addf %6, %8 : vector<2x128xf32>
    %cst_9 = arith.constant dense<0xFF800000> : vector<128xf32>
    %10 = vector.multi_reduction <maximumf>, %9, %cst_9 [0] : vector<2x128xf32> to vector<128xf32>
    %11 = vector.shape_cast %10 : vector<128xf32> to vector<1x128xf32>
    %12 = vector.broadcast %11 : vector<1x128xf32> to vector<2x128xf32>
    %13 = arith.subf %9, %12 : vector<2x128xf32>
    %14 = math.exp %13 : vector<2x128xf32>
    %cst_10 = arith.constant dense<0.000000e+00> : vector<128xf32>
    %15 = vector.multi_reduction <add>, %14, %cst_10 [0] : vector<2x128xf32> to vector<128xf32>
    %16 = vector.shape_cast %15 : vector<128xf32> to vector<1x128xf32>
    %17 = tpu.reciprocal %16 {approx = true} : vector<1x128xf32> -> vector<1x128xf32>
    %18 = arith.mulf %16, %17 : vector<1x128xf32>
    %cst_11 = arith.constant 2.000000e+00 : f32
    %19 = vector.broadcast %cst_11 : f32 to vector<1x128xf32>
    %20 = arith.subf %19, %18 : vector<1x128xf32>
    %21 = arith.mulf %17, %20 : vector<1x128xf32>
    %22 = vector.broadcast %21 : vector<1x128xf32> to vector<2x128xf32>
    %23 = arith.mulf %14, %22 : vector<2x128xf32>
    %c0_12 = arith.constant 0 : index
    %c0_13 = arith.constant 0 : index
    %24 = vector.load %arg5[%c0_12, %c0_13] : memref<2x128xf32, #tpu.memory_space<vmem>>, vector<2x128xf32>
    tpu.vector_store %arg5[%c0_12, %c0_13], %23 {strides = array<i32>} : memref<2x128xf32, #tpu.memory_space<vmem>>, vector<2x128xf32>,
    return
  }
  func.func @transform_0(%arg0: i32) -> (i32, i32) {
    %c0_i32 = arith.constant 0 : i32
    %c0_i32_0 = arith.constant 0 : i32
    return %c0_i32, %arg0 : i32, i32
  }
  func.func @transform_1(%arg0: i32) -> (i32, i32) {
    %c0_i32 = arith.constant 0 : i32
    %c0_i32_0 = arith.constant 0 : i32
    %c0_i32_1 = arith.constant 0 : i32
    return %c0_i32, %c0_i32_0 : i32, i32
  }
  func.func @transform_2(%arg0: i32) -> (i32, i32) {
    %c0_i32 = arith.constant 0 : i32
    %c0_i32_0 = arith.constant 0 : i32
    %c0_i32_1 = arith.constant 0 : i32
    return %c0_i32, %c0_i32_0 : i32, i32
  }
  func.func @transform_3(%arg0: i32) -> (i32, i32) {
    %c0_i32 = arith.constant 0 : i32
    %c0_i32_0 = arith.constant 0 : i32
    %c0_i32_1 = arith.constant 0 : i32
    return %c0_i32, %c0_i32_0 : i32, i32
  }
  func.func @transform_4(%arg0: i32) -> (i32, i32) {
    %c0_i32 = arith.constant 0 : i32
    %c0_i32_0 = arith.constant 0 : i32
    return %c0_i32, %arg0 : i32, i32
  }
}

</mosaic_0001>

<bundles_post_ra>
// kernel: tpu_custom_call.1
= control target key start
LH: loop header
LB: loop body
LE: loop exit
PB: predicated region body
PF: predicated region fallthrough
CT: control target
= control target key end

     0   :  { %vm35_vm0 = vcmask 64512   ;;  %s3330_s0 = inlined_call_operand.vmem [shape: f32[8,128], index: 0, kind: input, shape index: {}]   ;;  %s3331_s1 = inlined_call_operand.vmem [shape: f32[128,8], index: 1, kind: input, shape index: {}]   ;;  %s3332_s2 = inlined_call_operand.vmem [shape: f32[2,128], index: 2, kind: input, shape index: {}]   ;;  %s3333_s3 = inlined_call_operand.vmem [shape: f32[2,1], index: 3, kind: input, shape index: {}]   ;;  %s3334_s4 = inlined_call_operand.hbm [shape: f32[2,128], index: 4, kind: output, shape index: {}]  }
   0x1   :  { %v34_v0 = vld [vmem:[%s3330_s0] sm:$0xff]  ;;  %v19_v2 = vld [vmem:[%s3331_s1 + $0x8] sm:$0xff]  ;;  %v20_v6 = vld [vmem:[%s3331_s1 + $0x10] sm:$0xff] }
   0x2   :  { %v18_v1 = vld [vmem:[%s3331_s1] sm:$0xff]  ;;  %v2755_v3 = vand.u32 4294901760, %v34_v0  ;;  %v40_v5 = vsel %vm35_vm0, %v19_v2, 0  ;;  %v21_v7 = vld [vmem:[%s3331_s1 + $0x18] sm:$0xff]  ;;  %v43_v11 = vsel %vm35_vm0, %v20_v6, 0  ;;  %v23_v13 = vld [vmem:[%s3331_s1 + $0x28] sm:$0xff] }
   0x3   :  { %v37_v4 = vsel %vm35_vm0, %v18_v1, 0  ;;  %v22_v8 = vld [vmem:[%s3331_s1 + $0x20] sm:$0xff]  ;;  %v2770_v10 = vand.u32 4294901760, %v40_v5  ;;  %v46_v12 = vsel %vm35_vm0, %v21_v7, 0  ;;  %v2781_v15 = vand.u32 4294901760, %v43_v11  ;;  %v24_v18 = vld [vmem:[%s3331_s1 + $0x30] sm:$0xff] }
   0x4   :  { %v2768_v9 = vand.u32 4294901760, %v37_v4  ;;  %2081 = vmatprep.subr.mxu0 %v2755_v3  ;;  %v2779_v14 = vsub.f32 %v34_v0, %v2755_v3  ;;  %v2783_v16 = vand.u32 4294901760, %v46_v12  ;;  %v49_v17 = vsel %vm35_vm0, %v22_v8, 0 }
   0x5   :  { %2082 = vmatpush3.msra.mxu0 %v2755_v3  ;;  %v2794_v20 = vsub.f32 %v40_v5, %v2770_v10  ;;  %v2796_v21 = vand.u32 4294901760, %v49_v17  ;;  %v52_v22 = vsel %vm35_vm0, %v23_v13, 0  ;;  %v2803_v24 = vsub.f32 %v43_v11, %v2781_v15 }
   0x6   :  { %v2791_v19 = vsub.f32 %v37_v4, %v2768_v9  ;;  %v2800_v23 = vand.u32 4294901760, %v2779_v14  ;;  %v2806_v25 = vsub.f32 %v46_v12, %v2783_v16  ;;  %v2808_v26 = vand.u32 4294901760, %v52_v22 }
   0x7   :  { %v162_v28 = vand.u32 4294901760, %v2794_v20  ;;  %v2813_v29 = vsub.f32 %v49_v17, %v2796_v21  ;;  %v55_v30 = vsel %vm35_vm0, %v24_v18, 0 }
   0x8   :  { %v152_v27 = vand.u32 4294901760, %v2791_v19 }
   0x9   :  { %9 = vsyncpa [#allocation3], 0  ;;  %v314_v31 = vsub.f32 %v2779_v14, %v2800_v23  ;;  %v172_v32 = vand.u32 4294901760, %v2803_v24  ;;  %v182_v33 = vand.u32 4294901760, %v2806_v25  ;;  %v2821_v34 = vsub.f32 %v52_v22, %v2808_v26  ;;  %v25_v39 = vld [vmem:[%s3331_s1 + $0x38] sm:$0xff]  ;;  %v26_v44 = vld [vmem:[%s3331_s1 + $0x40] sm:$0xff] }
   0xa   :  { %v153_v35 = vsub.f32 %v2791_v19, %v152_v27  ;;  %v163_v36 = vsub.f32 %v2794_v20, %v162_v28  ;;  %v192_v37 = vand.u32 4294901760, %v2813_v29  ;;  %v2830_v38 = vand.u32 4294901760, %v55_v30  ;;  %v27_v49 = vld [vmem:[%s3331_s1 + $0x48] sm:$0xff]  ;;  %v28_v50 = vld [vmem:[%s3331_s1 + $0x50] sm:$0xff]  ;;  %v29_v55 = vld [vmem:[%s3331_s1 + $0x58] sm:$0xff] }
   0xb   :  { %v315_v40 = vand.u32 4294901760, %v314_v31  ;;  %v173_v41 = vsub.f32 %v2803_v24, %v172_v32  ;;  %v183_v42 = vsub.f32 %v2806_v25, %v182_v33  ;;  %v202_v43 = vand.u32 4294901760, %v2821_v34  ;;  %v30_v60 = vld [vmem:[%s3331_s1 + $0x60] sm:$0xff]  ;;  %v31_v61 = vld [vmem:[%s3331_s1 + $0x68] sm:$0xff]  ;;  %v32_v13 = vld [vmem:[%s3331_s1 + $0x70] sm:$0xff] }
   0xc   :  { %v154_v45 = vand.u32 4294901760, %v153_v35  ;;  %v164_v46 = vand.u32 4294901760, %v163_v36  ;;  %v193_v47 = vsub.f32 %v2813_v29, %v192_v37  ;;  %v2849_v48 = vsub.f32 %v55_v30, %v2830_v38 }
   0xd   :  { %2107 = vmatprep.subr.mxu0 %v315_v40  ;;  %v174_v51 = vand.u32 4294901760, %v173_v41  ;;  %v184_v52 = vand.u32 4294901760, %v183_v42  ;;  %v203_v53 = vsub.f32 %v2821_v34, %v202_v43  ;;  %v58_v54 = vsel %vm35_vm0, %v25_v39, 0 }
   0xe   :  { %2083 = vmatprep.mubr.f32.mxu0 %v154_v45  ;;  %v194_v56 = vand.u32 4294901760, %v193_v47  ;;  %v212_v57 = vand.u32 4294901760, %v2849_v48  ;;  %v2865_v58 = vand.u32 4294901760, %v58_v54  ;;  %v61_v59 = vsel %vm35_vm0, %v26_v44, 0 }
   0xf   :  { %2084 = vmatmul.mubr.f32.vlgmr.msra.gmra.mrb[0].mxu0 %v164_v46  ;;  %v204_v62 = vand.u32 4294901760, %v203_v53  ;;  %v2874_v63 = vand.u32 4294901760, %v61_v59  ;;  %v64_v0 = vsel %vm35_vm0, %v27_v49, 0  ;;  %v67_v1 = vsel %vm35_vm0, %v28_v50, 0  ;;  %v33_v49 = vld [vmem:[%s3331_s1 + $0x78] sm:$0xff] }
  0x10   :  { %2108 = vmatpush3.msra.mxu0 %v315_v40  ;;  %2086 = vmatprep.mubr.f32.mxu0 %v174_v51  ;;  %v213_v2 = vsub.f32 %v2849_v48, %v212_v57  ;;  %v2882_v4 = vsub.f32 %v58_v54, %v2865_v58  ;;  %v2884_v5 = vand.u32 4294901760, %v64_v0  ;;  %v2886_v6 = vand.u32 4294901760, %v67_v1 }
  0x11   :  { %v2889_v7 = vsub.f32 %v61_v59, %v2874_v63  ;;  %v70_v8 = vsel %vm35_vm0, %v29_v55, 0  ;;  %v73_v11 = vsel %vm35_vm0, %v30_v60, 0  ;;  %v76_v12 = vsel %vm35_vm0, %v31_v61, 0  ;;  %2133 = vmatprep.subr.mxu0 %v2779_v14 }
  0x12   :  { %v214_v17 = vand.u32 4294901760, %v213_v2  ;;  %v222_v18 = vand.u32 4294901760, %v2882_v4  ;;  %v2900_v22 = vsub.f32 %v64_v0, %v2884_v5  ;;  %v2903_v30 = vsub.f32 %v67_v1, %v2886_v6 }
  0x13   :  { %2087 = vmatmul.mubr.f32.gmra.mrb[2].mxu0 %v184_v52  ;;  %v232_v31 = vand.u32 4294901760, %v2889_v7  ;;  %v2906_v35 = vand.u32 4294901760, %v70_v8  ;;  %v2908_v36 = vand.u32 4294901760, %v73_v11  ;;  %v2910_v39 = vand.u32 4294901760, %v76_v12 }
  0x14   :  { %2089 = vmatprep.mubr.f32.mxu0 %v194_v56  ;;  %v223_v40 = vsub.f32 %v2882_v4, %v222_v18  ;;  %v242_v41 = vand.u32 4294901760, %v2900_v22  ;;  %v252_v42 = vand.u32 4294901760, %v2903_v30  ;;  %v79_v44 = vsel %vm35_vm0, %v32_v13, 0 }
  0x15   :  { %v233_v45 = vsub.f32 %v2889_v7, %v232_v31  ;;  %v2922_v46 = vsub.f32 %v70_v8, %v2906_v35  ;;  %v2925_v47 = vsub.f32 %v73_v11, %v2908_v36  ;;  %v2931_v50 = vsub.f32 %v76_v12, %v2910_v39 }
  0x16   :  { %v2933_v51 = vand.u32 4294901760, %v79_v44  ;;  %v224_v52 = vand.u32 4294901760, %v223_v40  ;;  %v243_v53 = vsub.f32 %v2900_v22, %v242_v41  ;;  %v253_v54 = vsub.f32 %v2903_v30, %v252_v42 }
  0x17   :  { %2090 = vmatmul.mubr.f32.gmra.mrb[4].mxu0 %v204_v62  ;;  %v262_v55 = vand.u32 4294901760, %v2922_v46  ;;  %v234_v56 = vand.u32 4294901760, %v233_v45  ;;  %v272_v59 = vand.u32 4294901760, %v2925_v47  ;;  %v82_v61 = vsel %vm35_vm0, %v33_v49, 0 }
  0x18   :  { %2092 = vmatprep.mubr.f32.mxu0 %v214_v17  ;;  %v2944_v60 = vsub.f32 %v79_v44, %v2933_v51  ;;  %v2947_v62 = vand.u32 4294901760, %v82_v61  ;;  %v244_v0 = vand.u32 4294901760, %v243_v53  ;;  %v282_v2 = vand.u32 4294901760, %v2931_v50 }
  0x19   :  { %v263_v1 = vsub.f32 %v2922_v46, %v262_v55  ;;  %v254_v11 = vand.u32 4294901760, %v253_v54  ;;  %v273_v12 = vsub.f32 %v2925_v47, %v272_v59  ;;  %vm2717_vm1 = vmmov 0  }
  0x1a   :  { %v2954_v8 = vsub.f32 %v82_v61, %v2947_v62  ;;  %v292_v13 = vand.u32 4294901760, %v2944_v60  ;;  %v283_v40 = vsub.f32 %v2931_v50, %v282_v2  ;;  %vm1839_vm2 = vcmask 1041408  }
  0x1b   :  { %2093 = vmatmul.mubr.f32.gmra.mrb[6].mxu0 %v224_v52  ;;  %v264_v17 = vand.u32 4294901760, %v263_v1  ;;  %v274_v45 = vand.u32 4294901760, %v273_v12 }
  0x1c   :  { %2095 = vmatprep.mubr.f32.mxu0 %v234_v56  ;;  %v302_v44 = vand.u32 4294901760, %v2954_v8  ;;  %v293_v49 = vsub.f32 %v2944_v60, %v292_v13  ;;  %v284_v52 = vand.u32 4294901760, %v283_v40 }
  0x1e   :  { %v303_v53 = vsub.f32 %v2954_v8, %v302_v44  ;;  %v294_v54 = vand.u32 4294901760, %v293_v49 }
  0x1f   :  { %2096 = vmatmul.mubr.f32.gmra.mrb[8].mxu0 %v244_v0 }
  0x20   :  { %2098 = vmatprep.mubr.f32.mxu0 %v254_v11  ;;  %v304_v56 = vand.u32 4294901760, %v303_v53 }
  0x23   :  { %2099 = vmatmul.mubr.f32.gmra.mrb[10].mxu0 %v264_v17 }
  0x24   :  { %2101 = vmatprep.mubr.f32.mxu0 %v274_v45 }
  0x27   :  { %2102 = vmatmul.mubr.f32.gmra.mrb[12].mxu0 %v284_v52 }
  0x28   :  { %2104 = vmatprep.mubr.f32.mxu0 %v294_v54 }
  0x2b   :  { %2105 = vmatmul.mubr.f32.gmra.mrb[14].mxu0 %v304_v56 }
  0x2c   :  { %2109 = vmatprep.mubr.f32.mxu0 %v2768_v9 }
  0x2f   :  { %2110 = vmatmul.mubr.f32.vlgmr.msra.gmra.mrb[0].mxu0 %v2770_v10 }
  0x30   :  { %2134 = vmatpush3.msra.mxu0 %v2779_v14  ;;  %2112 = vmatprep.mubr.f32.mxu0 %v2781_v15 }
  0x31   :  { %2159 = vmatprep.subr.mxu0 %v2755_v3 }
  0x33   :  { %2113 = vmatmul.mubr.f32.gmra.mrb[2].mxu0 %v2783_v16 }
  0x34   :  { %2115 = vmatprep.mubr.f32.mxu0 %v2796_v21 }
  0x37   :  { %2116 = vmatmul.mubr.f32.gmra.mrb[4].mxu0 %v2808_v26 }
  0x38   :  { %2118 = vmatprep.mubr.f32.mxu0 %v2830_v38 }
  0x3b   :  { %2119 = vmatmul.mubr.f32.gmra.mrb[6].mxu0 %v2865_v58 }
  0x3c   :  { %2121 = vmatprep.mubr.f32.mxu0 %v2874_v63 }
  0x3f   :  { %2122 = vmatmul.mubr.f32.gmra.mrb[8].mxu0 %v2884_v5 }
  0x40   :  { %2124 = vmatprep.mubr.f32.mxu0 %v2886_v6 }
  0x43   :  { %2125 = vmatmul.mubr.f32.gmra.mrb[10].mxu0 %v2906_v35 }
  0x44   :  { %2127 = vmatprep.mubr.f32.mxu0 %v2908_v36 }
  0x47   :  { %2128 = vmatmul.mubr.f32.gmra.mrb[12].mxu0 %v2910_v39 }
  0x48   :  { %2130 = vmatprep.mubr.f32.mxu0 %v2933_v51 }
  0x4b   :  { %2131 = vmatmul.mubr.f32.gmra.mrb[14].mxu0 %v2947_v62 }
  0x4c   :  { %2135 = vmatprep.mubr.f32.mxu0 %v2791_v19 }
  0x4f   :  { %2136 = vmatmul.mubr.f32.vlgmr.msra.gmra.mrb[0].mxu0 %v2794_v20 }
  0x50   :  { %2160 = vmatpush3.msra.mxu0 %v2755_v3  ;;  %2138 = vmatprep.mubr.f32.mxu0 %v2803_v24 }
  0x51   :  { %2185 = vmatprep.subr.mxu0 %v2800_v23 }
  0x53   :  { %2139 = vmatmul.mubr.f32.gmra.mrb[2].mxu0 %v2806_v25 }
  0x54   :  { %2141 = vmatprep.mubr.f32.mxu0 %v2813_v29 }
  0x57   :  { %2142 = vmatmul.mubr.f32.gmra.mrb[4].mxu0 %v2821_v34 }
  0x58   :  { %2144 = vmatprep.mubr.f32.mxu0 %v2849_v48 }
  0x5b   :  { %2145 = vmatmul.mubr.f32.gmra.mrb[6].mxu0 %v2882_v4 }
  0x5c   :  { %2147 = vmatprep.mubr.f32.mxu0 %v2889_v7 }
  0x5f   :  { %2148 = vmatmul.mubr.f32.gmra.mrb[8].mxu0 %v2900_v22 }
  0x60   :  { %2150 = vmatprep.mubr.f32.mxu0 %v2903_v30 }
  0x63   :  { %2151 = vmatmul.mubr.f32.gmra.mrb[10].mxu0 %v2922_v46 }
  0x64   :  { %2153 = vmatprep.mubr.f32.mxu0 %v2925_v47 }
  0x67   :  { %2154 = vmatmul.mubr.f32.gmra.mrb[12].mxu0 %v2931_v50 }
  0x68   :  { %2156 = vmatprep.mubr.f32.mxu0 %v2944_v60 }
  0x6b   :  { %2157 = vmatmul.mubr.f32.gmra.mrb[14].mxu0 %v2954_v8 }
  0x6c   :  { %2161 = vmatprep.mubr.f32.mxu0 %v152_v27 }
  0x6f   :  { %2162 = vmatmul.mubr.f32.vlgmr.msra.gmra.mrb[0].mxu0 %v162_v28 }
  0x70   :  { %2186 = vmatpush3.msra.mxu0 %v2800_v23  ;;  %2164 = vmatprep.mubr.f32.mxu0 %v172_v32 }
  0x71   :  { %2211 = vmatprep.subr.mxu0 %v2755_v3 }
  0x73   :  { %2165 = vmatmul.mubr.f32.gmra.mrb[2].mxu0 %v182_v33 }
  0x74   :  { %2167 = vmatprep.mubr.f32.mxu0 %v192_v37 }
  0x77   :  { %2168 = vmatmul.mubr.f32.gmra.mrb[4].mxu0 %v202_v43 }
  0x78   :  { %2170 = vmatprep.mubr.f32.mxu0 %v212_v57 }
  0x7b   :  { %2171 = vmatmul.mubr.f32.gmra.mrb[6].mxu0 %v222_v18 }
  0x7c   :  { %2173 = vmatprep.mubr.f32.mxu0 %v232_v31 }
  0x7f   :  { %2174 = vmatmul.mubr.f32.gmra.mrb[8].mxu0 %v242_v41 }
  0x80   :  { %2176 = vmatprep.mubr.f32.mxu0 %v252_v42 }
  0x83   :  { %2177 = vmatmul.mubr.f32.gmra.mrb[10].mxu0 %v262_v55 }
  0x84   :  { %2179 = vmatprep.mubr.f32.mxu0 %v272_v59 }
  0x87   :  { %2180 = vmatmul.mubr.f32.gmra.mrb[12].mxu0 %v282_v2 }
  0x88   :  { %2182 = vmatprep.mubr.f32.mxu0 %v292_v13 }
  0x8b   :  { %2183 = vmatmul.mubr.f32.gmra.mrb[14].mxu0 %v302_v44 }
  0x8c   :  { %2187 = vmatprep.mubr.f32.mxu0 %v2768_v9 }
  0x8f   :  { %2188 = vmatmul.mubr.f32.vlgmr.msra.gmra.mrb[0].mxu0 %v2770_v10 }
  0x90   :  { %2212 = vmatpush3.msra.mxu0 %v2755_v3  ;;  %2190 = vmatprep.mubr.f32.mxu0 %v2781_v15  ;;  %v2716_v3 = vmov 0.0|0.0  }
  0x91   :  { %2447 = vmatprep.subr.bf16.mxu1 %v2716_v3 }
  0x93   :  { %2191 = vmatmul.mubr.f32.gmra.mrb[2].mxu0 %v2783_v16 }
  0x94   :  { %2193 = vmatprep.mubr.f32.mxu0 %v2796_v21 }
  0x97   :  { %2194 = vmatmul.mubr.f32.gmra.mrb[4].mxu0 %v2808_v26 }
  0x98   :  { %2196 = vmatprep.mubr.f32.mxu0 %v2830_v38 }
  0x9b   :  { %2197 = vmatmul.mubr.f32.gmra.mrb[6].mxu0 %v2865_v58 }
  0x9c   :  { %2199 = vmatprep.mubr.f32.mxu0 %v2874_v63 }
  0x9f   :  { %2200 = vmatmul.mubr.f32.gmra.mrb[8].mxu0 %v2884_v5 }
  0xa0   :  { %2202 = vmatprep.mubr.f32.mxu0 %v2886_v6 }
  0xa3   :  { %2203 = vmatmul.mubr.f32.gmra.mrb[10].mxu0 %v2906_v35 }
  0xa4   :  { %2205 = vmatprep.mubr.f32.mxu0 %v2908_v36 }
  0xa7   :  { %2206 = vmatmul.mubr.f32.gmra.mrb[12].mxu0 %v2910_v39 }
  0xa8   :  { %2208 = vmatprep.mubr.f32.mxu0 %v2933_v51 }
  0xab   :  { %2209 = vmatmul.mubr.f32.gmra.mrb[14].mxu0 %v2947_v62 }
  0xac   :  { %2213 = vmatprep.mubr.f32.mxu0 %v2768_v9  ;;  %v2718_v9 = vmov 0.0  }
  0xad   :  { %2269 = vmatprep.mubr.msk.f32.mxu1 %vm2717_vm1, %v2718_v9 }
  0xaf   :  { %2214 = vmatmul.mubr.f32.vlgmr.msra.gmra.mrb[0].mxu0 %v2770_v10  ;;  %v1191_v10 = vld [vmem:[%s3332_s2] sm:$0x3] }
  0xb0   :  { %2216 = vmatprep.mubr.f32.mxu0 %v2781_v15  ;;  %v3079_v19 = vand.u32 4294901760, %v1191_v10 }
  0xb2   :  { %v3084_v28 = vsub.f32 %v1191_v10, %v3079_v19 }
  0xb3   :  { %2217 = vmatmul.mubr.f32.gmra.mrb[2].mxu0 %v2783_v16 }
  0xb4   :  { %2219 = vmatprep.mubr.f32.mxu0 %v2796_v21 }
  0xb7   :  { %2220 = vmatmul.mubr.f32.gmra.mrb[4].mxu0 %v2808_v26 }
  0xb8   :  { %2222 = vmatprep.mubr.f32.mxu0 %v2830_v38 }
  0xbb   :  { %2223 = vmatmul.mubr.f32.gmra.mrb[6].mxu0 %v2865_v58 }
  0xbc   :  { %2225 = vmatprep.mubr.f32.mxu0 %v2874_v63 }
  0xbf   :  { %2226 = vmatmul.mubr.f32.gmra.mrb[8].mxu0 %v2884_v5 }
  0xc0   :  { %2228 = vmatprep.mubr.f32.mxu0 %v2886_v6  ;;  %v3335_v6 = vand.u32 4294901760, %v3084_v28 }
  0xc2   :  { %v3119_v61 = vsub.f32 %v3084_v28, %v3335_v6 }
  0xc3   :  { %2229 = vmatmul.mubr.f32.gmra.mrb[10].mxu0 %v2906_v35 }
  0xc4   :  { %2231 = vmatprep.mubr.f32.mxu0 %v2908_v36 }
  0xc7   :  { %2232 = vmatmul.mubr.f32.gmra.mrb[12].mxu0 %v2910_v39 }
  0xc8   :  { %2234 = vmatprep.mubr.f32.mxu0 %v2933_v51 }
  0xcb   :  { %2235 = vmatmul.mubr.f32.gmra.mrb[14].mxu0 %v2947_v62 }
 0x182   :  { %v2215_v14 = vpop.f32.mrb[0].mxu0 }
 0x183   :  { %v1176_v15 = vmax.f32 %v2215_v14, 0.0  ;;  %v1081_v16 = vpop.f32.mrb[1].mxu0 }
 0x184   :  { %v1175_v20 = vmax.f32 %v1081_v16, 0.0 }
 0x185   :  { %v1202_v21 = vand.u32 4294901760, %v1176_v15 }
 0x186   :  { %v1199_v23 = vand.u32 4294901760, %v1175_v20  ;;  %v2218_v24 = vpop.f32.mrb[2].mxu0 }
 0x187   :  { %v3081_v25 = vsub.f32 %v1176_v15, %v1202_v21  ;;  %v1178_v26 = vmax.f32 %v2218_v24, 0.0  ;;  %v1093_v27 = vpop.f32.mrb[3].mxu0 }
 0x188   :  { %v3086_v29 = vsub.f32 %v1175_v20, %v1199_v23  ;;  %v1177_v32 = vmax.f32 %v1093_v27, 0.0  ;;  %v3088_v33 = vpack.c.bf16 %v1202_v21, %v1199_v23 }
 0x189   :  { %v1299_v34 = vand.u32 4294901760, %v3081_v25  ;;  %v1208_v37 = vand.u32 4294901760, %v1178_v26 }
 0x18a   :  { %v1292_v38 = vand.u32 4294901760, %v3086_v29  ;;  %v2496_v43 = vpack.c.bf16 %v3081_v25, %v3086_v29  ;;  %v1205_v48 = vand.u32 4294901760, %v1177_v32  ;;  %v2221_v57 = vpop.f32.mrb[4].mxu0  ;;  %2449 = vmatpush3.bf16.msra.mxu1 %v3088_v33 }
 0x18b   :  { %v1300_v58 = vsub.f32 %v3081_v25, %v1299_v34  ;;  %v3096_v63 = vsub.f32 %v1178_v26, %v1208_v37  ;;  %v1180_v4 = vmax.f32 %v2221_v57, 0.0  ;;  %v1105_v5 = vpop.f32.mrb[5].mxu0  ;;  %2450 = vmatprep.subr.bf16.mxu1 %v2716_v3 }
 0x18c   :  { %v1293_v7 = vsub.f32 %v3086_v29, %v1292_v38  ;;  %v3101_v18 = vsub.f32 %v1177_v32, %v1205_v48  ;;  %v1179_v22 = vmax.f32 %v1105_v5, 0.0  ;;  %v3103_v30 = vpack.c.bf16 %v1208_v37, %v1205_v48 }
 0x18d   :  { %v1301_v31 = vand.u32 4294901760, %v1300_v58  ;;  %v1313_v35 = vand.u32 4294901760, %v3096_v63  ;;  %v1214_v36 = vand.u32 4294901760, %v1180_v4  ;;  %v3106_v39 = vpack.c.bf16 %v1299_v34, %v1292_v38 }
 0x18e   :  { %v1294_v41 = vand.u32 4294901760, %v1293_v7  ;;  %v1306_v42 = vand.u32 4294901760, %v3101_v18  ;;  %v2499_v46 = vpack.c.bf16 %v3096_v63, %v3101_v18  ;;  %v1211_v47 = vand.u32 4294901760, %v1179_v22  ;;  %v2224_v50 = vpop.f32.mrb[6].mxu0  ;;  %2452 = vmatpush3.bf16.msra.mxu1 %v3103_v30 }
 0x18f   :  { %v1314_v51 = vsub.f32 %v3096_v63, %v1313_v35  ;;  %v3113_v55 = vsub.f32 %v1180_v4, %v1214_v36  ;;  %v1182_v59 = vmax.f32 %v2224_v50, 0.0  ;;  %v1117_v60 = vpop.f32.mrb[7].mxu0  ;;  %2453 = vmatprep.subr.bf16.mxu1 %v2716_v3 }
 0x190   :  { %v1307_v62 = vsub.f32 %v3101_v18, %v1306_v42  ;;  %v3122_v0 = vsub.f32 %v1179_v22, %v1211_v47  ;;  %v1181_v1 = vmax.f32 %v1117_v60, 0.0  ;;  %v3124_v2 = vpack.c.bf16 %v1214_v36, %v1211_v47 }
 0x191   :  { %v1315_v8 = vand.u32 4294901760, %v1314_v51  ;;  %v1327_v11 = vand.u32 4294901760, %v3113_v55  ;;  %v1220_v12 = vand.u32 4294901760, %v1182_v59  ;;  %v3127_v13 = vpack.c.bf16 %v1301_v31, %v1294_v41 }
 0x192   :  { %v1308_v17 = vand.u32 4294901760, %v1307_v62  ;;  %v1320_v40 = vand.u32 4294901760, %v3122_v0  ;;  %v2502_v44 = vpack.c.bf16 %v3113_v55, %v3122_v0  ;;  %v1217_v45 = vand.u32 4294901760, %v1181_v1  ;;  %v2227_v49 = vpop.f32.mrb[8].mxu0  ;;  %2455 = vmatpush3.bf16.msra.mxu1 %v3124_v2 }
 0x193   :  { %v1328_v52 = vsub.f32 %v3113_v55, %v1327_v11  ;;  %v3134_v53 = vsub.f32 %v1182_v59, %v1220_v12  ;;  %v1184_v54 = vmax.f32 %v2227_v49, 0.0  ;;  %v1129_v56 = vpop.f32.mrb[9].mxu0  ;;  %2456 = vmatprep.subr.bf16.mxu1 %v2716_v3  ;;  %v3137_v10 = vpack.c.bf16 %v1313_v35, %v1306_v42 }
 0x194   :  { %v1321_v14 = vsub.f32 %v3122_v0, %v1320_v40  ;;  %v3140_v15 = vsub.f32 %v1181_v1, %v1217_v45  ;;  %v1183_v16 = vmax.f32 %v1129_v56, 0.0  ;;  %v3142_v20 = vpack.c.bf16 %v1220_v12, %v1217_v45 }
 0x195   :  { %v1329_v21 = vand.u32 4294901760, %v1328_v52  ;;  %v1341_v23 = vand.u32 4294901760, %v3134_v53  ;;  %v1226_v24 = vand.u32 4294901760, %v1184_v54  ;;  %v3145_v26 = vpack.c.bf16 %v1315_v8, %v1308_v17 }
 0x196   :  { %v1322_v27 = vand.u32 4294901760, %v1321_v14  ;;  %v1334_v32 = vand.u32 4294901760, %v3140_v15  ;;  %v2505_v34 = vpack.c.bf16 %v3134_v53, %v3140_v15  ;;  %v1223_v37 = vand.u32 4294901760, %v1183_v16  ;;  %v2230_v38 = vpop.f32.mrb[10].mxu0  ;;  %2458 = vmatpush3.bf16.msra.mxu1 %v3142_v20 }
 0x197   :  { %v1342_v48 = vsub.f32 %v3134_v53, %v1341_v23  ;;  %v3152_v57 = vsub.f32 %v1184_v54, %v1226_v24  ;;  %v1186_v58 = vmax.f32 %v2230_v38, 0.0  ;;  %v1141_v4 = vpop.f32.mrb[11].mxu0  ;;  %2459 = vmatprep.subr.bf16.mxu1 %v2716_v3  ;;  %v3155_v5 = vpack.c.bf16 %v1327_v11, %v1320_v40 }
 0x198   :  { %v1335_v7 = vsub.f32 %v3140_v15, %v1334_v32  ;;  %v3158_v22 = vsub.f32 %v1183_v16, %v1223_v37  ;;  %v1185_v31 = vmax.f32 %v1141_v4, 0.0  ;;  %v3160_v35 = vpack.c.bf16 %v1226_v24, %v1223_v37 }
 0x199   :  { %v1343_v36 = vand.u32 4294901760, %v1342_v48  ;;  %v1355_v41 = vand.u32 4294901760, %v3152_v57  ;;  %v1232_v42 = vand.u32 4294901760, %v1186_v58  ;;  %v3163_v47 = vpack.c.bf16 %v1329_v21, %v1322_v27 }
 0x19a   :  { %v1336_v50 = vand.u32 4294901760, %v1335_v7  ;;  %v1348_v51 = vand.u32 4294901760, %v3158_v22  ;;  %v1229_v60 = vand.u32 4294901760, %v1185_v31  ;;  %v2233_v62 = vpop.f32.mrb[12].mxu0  ;;  %2461 = vmatpush3.bf16.msra.mxu1 %v3160_v35  ;;  %v3173_v17 = vpack.c.bf16 %v1341_v23, %v1334_v32 }
 0x19b   :  { %v1356_v1 = vsub.f32 %v3152_v57, %v1355_v41  ;;  %v3170_v8 = vsub.f32 %v1186_v58, %v1232_v42  ;;  %v1188_v11 = vmax.f32 %v2233_v62, 0.0  ;;  %v1153_v12 = vpop.f32.mrb[13].mxu0  ;;  %2462 = vmatprep.subr.bf16.mxu1 %v2716_v3  ;;  %v3336_v25 = vpack.c.bf16 %v3152_v57, %v3158_v22 }
 0x19c   :  { %v1349_v40 = vsub.f32 %v3158_v22, %v1348_v51  ;;  %v3176_v45 = vsub.f32 %v1185_v31, %v1229_v60  ;;  %v1187_v49 = vmax.f32 %v1153_v12, 0.0  ;;  %v3178_v52 = vpack.c.bf16 %v1232_v42, %v1229_v60 }
 0x19d   :  { %v1357_v54 = vand.u32 4294901760, %v1356_v1  ;;  %v1369_v56 = vand.u32 4294901760, %v3170_v8  ;;  %v1238_v14 = vand.u32 4294901760, %v1188_v11  ;;  %v2481_v16 = vpack.c.bf16 %v1343_v36, %v1336_v50 }
 0x19e   :  { %v1350_v21 = vand.u32 4294901760, %v1349_v40  ;;  %v1362_v24 = vand.u32 4294901760, %v3176_v45  ;;  %v1235_v23 = vand.u32 4294901760, %v1187_v49  ;;  %v2236_v32 = vpop.f32.mrb[14].mxu0  ;;  %2464 = vmatpush3.bf16.msra.mxu1 %v3178_v52  ;;  %v3189_v4 = vpack.c.bf16 %v1355_v41, %v1348_v51 }
 0x19f   :  { %v1370_v37 = vsub.f32 %v3170_v8, %v1369_v56  ;;  %v3186_v38 = vsub.f32 %v1188_v11, %v1238_v14  ;;  %v1190_v48 = vmax.f32 %v2236_v32, 0.0  ;;  %v1165_v58 = vpop.f32.mrb[15].mxu0  ;;  %2465 = vmatprep.subr.bf16.mxu1 %v2716_v3  ;;  %v3337_v29 = vpack.c.bf16 %v3170_v8, %v3176_v45 }
 0x1a0   :  { %v1363_v7 = vsub.f32 %v3176_v45, %v1362_v24  ;;  %v3192_v31 = vsub.f32 %v1187_v49, %v1235_v23  ;;  %v1189_v36 = vmax.f32 %v1165_v58, 0.0  ;;  %v3194_v42 = vpack.c.bf16 %v1238_v14, %v1235_v23 }
 0x1a1   :  { %v1371_v50 = vand.u32 4294901760, %v1370_v37  ;;  %v1383_v60 = vand.u32 4294901760, %v3186_v38  ;;  %v1244_v62 = vand.u32 4294901760, %v1190_v48  ;;  %v2484_v1 = vpack.c.bf16 %v1357_v54, %v1350_v21 }
 0x1a2   :  { %v1364_v11 = vand.u32 4294901760, %v1363_v7  ;;  %v1376_v12 = vand.u32 4294901760, %v3192_v31  ;;  %v2514_v40 = vpack.c.bf16 %v3186_v38, %v3192_v31  ;;  %v1241_v41 = vand.u32 4294901760, %v1189_v36  ;;  %2467 = vmatpush3.bf16.msra.mxu1 %v3194_v42 }
 0x1a3   :  { %v1384_v51 = vsub.f32 %v3186_v38, %v1383_v60  ;;  %v1396_v49 = vsub.f32 %v1190_v48, %v1244_v62  ;;  %2468 = vmatprep.subr.bf16.mxu1 %v2716_v3  ;;  %v3203_v14 = vpack.c.bf16 %v1369_v56, %v1362_v24  ;;  %v1283_v7 = vand.u32 4294901760, %v3119_v61 }
 0x1a4   :  { %v1377_v23 = vsub.f32 %v3192_v31, %v1376_v12  ;;  %v3206_v32 = vpack.c.bf16 %v1244_v62, %v1241_v41  ;;  %v1389_v54 = vsub.f32 %v1189_v36, %v1241_v41  ;;  %v2487_v21 = vpack.c.bf16 %v1371_v50, %v1364_v11 }
 0x1a5   :  { %v1385_v37 = vand.u32 4294901760, %v1384_v51  ;;  %v1397_v58 = vand.u32 4294901760, %v1396_v49  ;;  %v3209_v6 = vpack.c.bf16 %v1383_v60, %v1376_v12 }
 0x1a6   :  { %v1378_v27 = vand.u32 4294901760, %v1377_v23  ;;  %v1390_v59 = vand.u32 4294901760, %v1389_v54  ;;  %v2517_v38 = vpack.c.bf16 %v1396_v49, %v1389_v54  ;;  %2470 = vmatpush3.bf16.msra.mxu1 %v3206_v32 }
 0x1a7   :  { %v1398_v48 = vsub.f32 %v1396_v49, %v1397_v58  ;;  %2471 = vmatprep.subr.bf16.mxu1 %v2716_v3 }
 0x1a8   :  { %v1391_v56 = vsub.f32 %v1389_v54, %v1390_v59  ;;  %v2490_v24 = vpack.c.bf16 %v1385_v37, %v1378_v27  ;;  %v3213_v31 = vpack.c.bf16 %v1397_v58, %v1390_v59 }
 0x1a9   :  { %v1399_v36 = vand.u32 4294901760, %v1398_v48  ;;  %2270 = vmatmul.mubr.f32.vlgmr.msra.gmra.mrb[0].mxu1 %v1283_v7 }
 0x1aa   :  { %v1392_v50 = vand.u32 4294901760, %v1391_v56  ;;  %2473 = vmatpush3.bf16.msra.mxu1 %v3127_v13  ;;  %2304 = vmatprep.mubr.msk.f32.mxu1 %vm2717_vm1, %v2718_v9  ;;  %v1192_v13 = vld [vmem:[%s3333_s3] sm:$0x3]  ;;  %s2720_s3 = smov [#allocation2]  }
 0x1ab   :  { %2474 = vmatprep.subr.bf16.mxu1 %v2716_v3  ;;  %s1869_s23 = sshll.u32 %s2720_s3, 4  ;;  %s1870_s23 = int_to_ptr.vmem [resolvable:$true] %s1869_s23 }
 0x1ac   :  { %v2493_v61 = vpack.c.bf16 %v1399_v36, %v1392_v50  ;;  %s2692_s24 = scalar_lea.vmem %s1870_s23, 32  ;;  %p2697_p1 = scmp.lt.s32.totalorder %s1870_s23, %s1870_s23 }
 0x1ad   :  { %p2693_p0 = scmp.ne.s32.totalorder %s1870_s23, %s2692_s24  ;;  %p2698_p2 = scmp.lt.s32.totalorder %s2692_s24, %s2692_s24 }
 0x1ae   :  { %2476 = vmatpush3.bf16.msra.mxu1 %v3145_v26  ;;  %v2719_v26 = vmov 0  }
 0x1af   :  { %2477 = vmatprep.subr.bf16.mxu1 %v2716_v3  ;;  %2687 = vset.pattern.permute.xlu0 %v2719_v26  ;;  %p2699_p3 = por %p2698_p2, %p2697_p1 }
 0x1b0   :  { %1195 = vperm.xlu0 %2687, %v1192_v13  }
 0x1b1   :  { %p2700_p4 = pnand %p2699_p3, %p2693_p0 }
 0x1b2   :  { %2479 = vmatpush3.bf16.msra.mxu1 %v3163_v47 }
 0x1b3   :  { %2480 = vmatprep.subr.bf16.mxu1 %v2716_v3 }
 0x1b6   :  { %2482 = vmatpush3.bf16.msra.mxu1 %v2481_v16 }
 0x1b7   :  { %2483 = vmatprep.subr.bf16.mxu1 %v2716_v3 }
 0x1ba   :  { %2485 = vmatpush3.bf16.msra.mxu1 %v2484_v1 }
 0x1bb   :  { %2486 = vmatprep.subr.bf16.mxu1 %v2716_v3 }
 0x1be   :  { %2488 = vmatpush3.bf16.msra.mxu1 %v2487_v21 }
 0x1bf   :  { %2489 = vmatprep.subr.bf16.mxu1 %v2716_v3 }
 0x1c2   :  { %2491 = vmatpush3.bf16.msra.mxu1 %v2490_v24 }
 0x1c3   :  { %2492 = vmatprep.subr.bf16.mxu1 %v2716_v3 }
 0x1c6   :  { %2494 = vmatpush3.bf16.msra.mxu1 %v2493_v61 }
 0x1c7   :  { %2495 = vmatprep.subr.bf16.mxu1 %v2716_v3 }
 0x1c9   :  { %2305 = vmatmul.mubr.f32.vlgmr.msra.gmra.mrb[0].mxu1 %v3079_v19 }
 0x1ca   :  { %2497 = vmatpush3.bf16.msra.mxu1 %v2496_v43  ;;  %2339 = vmatprep.mubr.msk.f32.mxu1 %vm2717_vm1, %v2718_v9  ;;  %v3338_v43 = vand.u32 4294901760, %v3084_v28 }
 0x1cb   :  { %2498 = vmatprep.subr.bf16.mxu1 %v2716_v3 }
 0x1ce   :  { %2500 = vmatpush3.bf16.msra.mxu1 %v2499_v46 }
 0x1cf   :  { %2501 = vmatprep.subr.bf16.mxu1 %v2716_v3 }
 0x1d2   :  { %2503 = vmatpush3.bf16.msra.mxu1 %v2502_v44 }
 0x1d3   :  { %2504 = vmatprep.subr.bf16.mxu1 %v2716_v3 }
 0x1d6   :  { %2506 = vmatpush3.bf16.msra.mxu1 %v2505_v34 }
 0x1d7   :  { %2507 = vmatprep.subr.bf16.mxu1 %v2716_v3 }
 0x1da   :  { %2509 = vmatpush3.bf16.msra.mxu1 %v3336_v25 }
 0x1db   :  { %2510 = vmatprep.subr.bf16.mxu1 %v2716_v3 }
 0x1de   :  { %2512 = vmatpush3.bf16.msra.mxu1 %v3337_v29 }
 0x1df   :  { %2513 = vmatprep.subr.bf16.mxu1 %v2716_v3 }
 0x1e2   :  { %2515 = vmatpush3.bf16.msra.mxu1 %v2514_v40 }
 0x1e3   :  { %2516 = vmatprep.subr.bf16.mxu1 %v2716_v3 }
 0x1e6   :  { %2518 = vmatpush3.bf16.msra.mxu1 %v2517_v38 }
 0x1e7   :  { %2519 = vmatprep.subr.bf16.mxu1 %v2716_v3 }
 0x1e9   :  { %2340 = vmatmul.mubr.f32.vlgmr.msra.gmra.mrb[0].mxu1 %v3084_v28 }
 0x1ea   :  { %2521 = vmatpush3.bf16.msra.mxu1 %v3088_v33  ;;  %2374 = vmatprep.mubr.msk.f32.mxu1 %vm2717_vm1, %v2718_v9 }
 0x1eb   :  { %2522 = vmatprep.subr.bf16.mxu1 %v2716_v3 }
 0x1ee   :  { %2524 = vmatpush3.bf16.msra.mxu1 %v3103_v30 }
 0x1ef   :  { %2525 = vmatprep.subr.bf16.mxu1 %v2716_v3 }
 0x1f2   :  { %2527 = vmatpush3.bf16.msra.mxu1 %v3124_v2 }
 0x1f3   :  { %2528 = vmatprep.subr.bf16.mxu1 %v2716_v3 }
 0x1f6   :  { %2530 = vmatpush3.bf16.msra.mxu1 %v3142_v20 }
 0x1f7   :  { %2531 = vmatprep.subr.bf16.mxu1 %v2716_v3 }
 0x1fa   :  { %2533 = vmatpush3.bf16.msra.mxu1 %v3160_v35 }
 0x1fb   :  { %2534 = vmatprep.subr.bf16.mxu1 %v2716_v3 }
 0x1fe   :  { %2536 = vmatpush3.bf16.msra.mxu1 %v3178_v52 }
 0x1ff   :  { %2537 = vmatprep.subr.bf16.mxu1 %v2716_v3 }
 0x202   :  { %2539 = vmatpush3.bf16.msra.mxu1 %v3194_v42 }
 0x203   :  { %2540 = vmatprep.subr.bf16.mxu1 %v2716_v3 }
 0x206   :  { %2542 = vmatpush3.bf16.msra.mxu1 %v3206_v32 }
 0x207   :  { %2543 = vmatprep.subr.bf16.mxu1 %v2716_v3 }
 0x209   :  { %2375 = vmatmul.mubr.f32.vlgmr.msra.gmra.mrb[0].mxu1 %v3338_v43 }
 0x20a   :  { %2545 = vmatpush3.bf16.msra.mxu1 %v3106_v39  ;;  %2409 = vmatprep.mubr.msk.f32.mxu1 %vm2717_vm1, %v2718_v9 }
 0x20b   :  { %2546 = vmatprep.subr.bf16.mxu1 %v2716_v3 }
 0x20e   :  { %2548 = vmatpush3.bf16.msra.mxu1 %v3137_v10 }
 0x20f   :  { %2549 = vmatprep.subr.bf16.mxu1 %v2716_v3 }
 0x212   :  { %2551 = vmatpush3.bf16.msra.mxu1 %v3155_v5 }
 0x213   :  { %2552 = vmatprep.subr.bf16.mxu1 %v2716_v3 }
 0x216   :  { %2554 = vmatpush3.bf16.msra.mxu1 %v3173_v17 }
 0x217   :  { %2555 = vmatprep.subr.bf16.mxu1 %v2716_v3 }
 0x21a   :  { %2557 = vmatpush3.bf16.msra.mxu1 %v3189_v4 }
 0x21b   :  { %2558 = vmatprep.subr.bf16.mxu1 %v2716_v3 }
 0x21e   :  { %2560 = vmatpush3.bf16.msra.mxu1 %v3203_v14 }
 0x21f   :  { %2561 = vmatprep.subr.bf16.mxu1 %v2716_v3 }
 0x222   :  { %2563 = vmatpush3.bf16.msra.mxu1 %v3209_v6 }
 0x223   :  { %2564 = vmatprep.subr.bf16.mxu1 %v2716_v3 }
 0x226   :  { %2566 = vmatpush3.bf16.msra.mxu1 %v3213_v31 }
 0x227   :  { %2567 = vmatprep.subr.bf16.mxu1 %v2716_v3 }
 0x229   :  { %2410 = vmatmul.mubr.f32.vlgmr.msra.gmra.mrb[0].mxu1 %v3079_v19 }
 0x22a   :  { %2569 = vmatpush3.bf16.msra.mxu1 %v3088_v33  ;;  %2444 = vmatprep.mubr.msk.f32.mxu1 %vm2717_vm1, %v2718_v9 }
 0x22b   :  { %2570 = vmatprep.subr.bf16.mxu1 %v2716_v3 }
 0x22e   :  { %2572 = vmatpush3.bf16.msra.mxu1 %v3103_v30 }
 0x22f   :  { %2573 = vmatprep.subr.bf16.mxu1 %v2716_v3  ;;  %v1196_v9 = vpop.permute.xlu0 %1195 }
 0x232   :  { %2575 = vmatpush3.bf16.msra.mxu1 %v3124_v2 }
 0x233   :  { %2576 = vmatprep.subr.bf16.mxu1 %v2716_v3 }
 0x236   :  { %2578 = vmatpush3.bf16.msra.mxu1 %v3142_v20 }
 0x237   :  { %2579 = vmatprep.subr.bf16.mxu1 %v2716_v3 }
 0x23a   :  { %2581 = vmatpush3.bf16.msra.mxu1 %v3160_v35 }
 0x23b   :  { %2582 = vmatprep.subr.bf16.mxu1 %v2716_v3 }
 0x23e   :  { %2584 = vmatpush3.bf16.msra.mxu1 %v3178_v52 }
 0x23f   :  { %2585 = vmatprep.subr.bf16.mxu1 %v2716_v3 }
 0x242   :  { %2587 = vmatpush3.bf16.msra.mxu1 %v3194_v42 }
 0x243   :  { %2588 = vmatprep.subr.bf16.mxu1 %v2716_v3 }
 0x246   :  { %2590 = vmatpush3.bf16.msra.mxu1 %v3206_v32 }
 0x249   :  { %2445 = vmatmul.mubr.f32.vlgmr.msra.gmra.mrb[0].mxu1 %v3079_v19 }
 0x31c   :  { %v1835_v28 = vpop.f32.mrb[0].mxu1 }
 0x31d   :  { %v2591_v33 = vadd.f32 %v1835_v28, %v1196_v9  ;;  %v2446_v63 = vpop.f32.mrb[1].mxu1 }
 0x31f   :  { %v1840_v6 = vsel %vm1839_vm2, %v2591_v33, -inf }
 0x320   :  { %v1841_v18 = vrot.slane %v1840_v6, 4 }
 0x322   :  { %v1842_v30 = vmax.f32 %v1840_v6, %v1841_v18 }
 0x324   :  { %v1843_v39 = vrot.slane %v1842_v30, 2 }
 0x326   :  { %v1844_v46 = vmax.f32 %v1842_v30, %v1843_v39 }
 0x328   :  { %v1845_v55 = vrot.slane %v1844_v46, 1 }
 0x32a   :  { %v1846_v0 = vmax.f32 %v1844_v46, %v1845_v55 }
 0x32c   :  { %v1847_v2 = vsub.f32 %v2591_v33, %v1846_v0 }
 0x32e   :  { %v1848_v44 = vmul.f32 1.442695, %v1847_v2 }
 0x330   :  { %2688 = vpow2.f32 %v1848_v44 }
 0x33a   :  { %v2689_v3 = vpop.eup %2688 }
 0x33b   :  { %v1850_v53 = vsel %vm1839_vm2, %v2689_v3, 0.0 }
 0x33c   :  { %v1851_v10 = vrot.slane %v1850_v53, 4 }
 0x33e   :  { %v1852_v15 = vadd.f32 %v1851_v10, %v1850_v53 }
 0x340   :  { %v1853_v19 = vrot.slane %v1852_v15, 2 }
 0x342   :  { %v1854_v20 = vadd.f32 %v1853_v19, %v1852_v15 }
 0x344   :  { %v1855_v34 = vrot.slane %v1854_v20, 1 }
 0x346   :  { %v1856_v57 = vadd.f32 %v1855_v34, %v1854_v20 }
 0x348   :  { %2690 = vrcp.f32 %v1856_v57 }
 0x352   :  { %v2691_v5 = vpop.eup %2690 }
 0x353   :  { %v1858_v22 = vmul.f32 %v2691_v5, %v1856_v57 }
 0x355   :  { %v1859_v35 = vsub.f32 2.0, %v1858_v22 }
 0x357   :  { %v1860_v47 = vmul.f32 %v2691_v5, %v1859_v35 }
 0x359   :  { %v1861_v59 = vmul.f32 %v2689_v3, %v1860_v47 }
 0x35b   :  { %1862 = vst [vmem:[#allocation2] sm:$0x3] %v1861_v59 }
 0x35c   :  { %2703 = shalt.err (!%p2700_p4)
}
 0x35d   :  { %s2704_s27 = scalar_lea.hbm %s3334_s4, 32 }
 0x35e   :  { %p2705_p5 = scmp.ne.s32.totalorder %s3334_s4, %s2704_s27  ;;  %p2708_p6 = scmp.lt.u32.totalorder %s2704_s27, %s3334_s4 }
 0x360   :  { %p2710_p7 = pnand %p2708_p6, %p2705_p5 }
 0x362   :  { %2713 = shalt.err (!%p2710_p7)
}
 0x363   :  { %1872 = dma.vmem_to_hbm [thread:$0]  %s1870_s23, 32, %s3334_s4, [#allocation3]  }
 0x364   :  { %2714 = dma.done.wait [#allocation3], 32  }
 0x365   :  { %2715 = vsyncadd [#allocation3], 4294967264 }
 0x366   :  { %1876 = vsyncpa [#allocation3], 1 }

</bundles_post_ra>
